<compile_context>
chip_gen: v6e
topology: v6e:2x2x1
jax: 0.10.0
libtpu: 0.0.40
codegen_flags: <defaults>
</compile_context>

<pallas_src>
import jax
import jax.numpy as jnp
from jax.experimental import pallas as pl
from jax.experimental.pallas import tpu as pltpu

_LANE = 128
_TM_MAX = 131072          # max batch rows per grid step
_TC_MAX = _TM_MAX // 4    # max lane-columns per step in the (8, n/4) layout


def _round_up(x, m):
    return (x + m - 1) // m * m


def _affine_kernel(x_ref, w_ref, b_ref, o_ref):
    """o = w0 * x[0:4, :] + w1 * x[4:8, :] + b   (sublane/lane-dense VPU FMAs).

    x_ref is an (8, tc) tile of the globally reshaped (8, n/4) feature-major
    input: rows 0-3 hold feature 0 (column-chunked), rows 4-7 hold feature 1 in
    matching chunks, so the (4, tc) output tile is exactly the corresponding
    flat slice of y.
    """
    x = x_ref[...].astype(jnp.float32)            # (8, tc)
    w0 = w_ref[0]                                 # fused weights as SMEM scalars
    w1 = w_ref[1]
    b = b_ref[0]
    y = x[0:4, :] * w0 + x[4:8, :] * w1 + b       # (4, tc)
    o_ref[...] = y.astype(o_ref.dtype)


def fuse_params(params):
    """Collapse the three activation-free Linear layers into one affine map.

    PyTorch convention: layer(x) = x @ W.T + b with W of shape (out, in).
    Done once at init time; no per-call transpose/matmul overhead remains.
    """
    w1t = params["w1"].T.astype(jnp.float32)      # (2, 10)
    w2t = params["w2"].T.astype(jnp.float32)      # (10, 10)
    w3t = params["w3"].T.astype(jnp.float32)      # (10, 1)
    w_eff = (w1t @ w2t @ w3t).reshape(2)          # (2,)
    b_eff = (params["b1"] @ w2t @ w3t
             + params["b2"] @ w3t
             + params["b3"]).reshape(1)           # (1,)
    return w_eff, b_eff


@jax.jit
def circle_model_1_forward(x, w_eff, b_eff):
    """Forward pass of CircleModel1. x: (N, 2) -> (N, 1), matching PyTorch."""
    n = x.shape[0]
    # Pad only to the dense-layout granularity (4 sublane chunks x 128 lanes =
    # 512 rows); the ragged last grid step is handled by Pallas.
    n_pad = _round_up(max(n, 1), 4 * _LANE)
    n4 = n_pad // 4

    # Tile width (lanes of the (8, n4) layout): large enough to amortize
    # per-step overhead, small enough for VMEM and for >=8 steps at large N
    # (so v7x's 2 TensorCores both get work via the "parallel" axis).
    tc = min(_TC_MAX, _round_up(pl.cdiv(n4, 8), _LANE))
    n_steps = pl.cdiv(n4, tc)

    # Layout plumbing (transpose + small pad + free reshape); allow_input_fusion
    # lets XLA fuse this producer into the pallas_call operand.
    xt = x.T                                       # (2, n) feature-major
    if n_pad != n:
        xt = jnp.pad(xt, ((0, 0), (0, n_pad - n)))
    xd = xt.reshape(8, n4)                         # sublane-dense layout

    out = pl.pallas_call(
        _affine_kernel,
        out_shape=jax.ShapeDtypeStruct((4, n4), x.dtype),
        grid=(n_steps,),
        in_specs=[
            pl.BlockSpec((8, tc), lambda i: (0, i)),                  # x tile
            pl.BlockSpec(memory_space=pltpu.MemorySpace.SMEM),        # w_eff (2,)
            pl.BlockSpec(memory_space=pltpu.MemorySpace.SMEM),        # b_eff (1,)
        ],
        out_specs=pl.BlockSpec((4, tc), lambda i: (0, i)),
        compiler_params=pltpu.CompilerParams(
            dimension_semantics=("parallel",),      # shard batch tiles on v7x's 2 TCs
            allow_input_fusion=[True, False, False],
            vmem_limit_bytes=32 * 1024 * 1024,      # explicit, safe on v5e/v6e/v7x
        ),
        cost_estimate=pl.CostEstimate(
            flops=4 * n_pad,            # 2 mul + 2 add per row
            transcendentals=0,
            bytes_accessed=12 * n_pad,  # 8 B in + 4 B out per row
        ),
    )(xd, w_eff, b_eff)

    # (4, n4) flattened row-major is exactly y[0:n_pad]; free reshape + tiny slice.
    return out.reshape(n_pad)[:n].reshape(n, 1)


def init_params(key):
    """Deterministic init mimicking PyTorch nn.Linear defaults
    (uniform(-1/sqrt(fan_in), 1/sqrt(fan_in)))."""
    ks = jax.random.split(key, 6)

    def u(k, shape, fan_in):
        bound = 1.0 / jnp.sqrt(float(fan_in))
        return jax.random.uniform(k, shape, jnp.float32, -bound, bound)

    return {
        "w1": u(ks[0], (10, 2), 2),
        "b1": u(ks[1], (10,), 2),
        "w2": u(ks[2], (10, 10), 10),
        "b2": u(ks[3], (10,), 10),
        "w3": u(ks[4], (1, 10), 10),
        "b3": u(ks[5], (1,), 10),
    }


def _reference(x, params):
    h = x @ params["w1"].T + params["b1"]
    h = h @ params["w2"].T + params["b2"]
    return h @ params["w3"].T + params["b3"]


if __name__ == "__main__":
    key = jax.random.PRNGKey(0)
    pkey, xkey, xkey2 = jax.random.split(key, 3)

    params = init_params(pkey)
    w_eff, b_eff = fuse_params(params)   # hoisted out of the per-call path

    # Small batch of 2-D "circle" points, consistent with in_features=2.
    x = jax.random.normal(xkey, (8, 2), dtype=jnp.float32)
    out = jax.block_until_ready(circle_model_1_forward(x, w_eff, b_eff))
    ref = _reference(x, params)
    assert out.shape == (8, 1)
    assert jnp.allclose(out, ref, atol=1e-4, rtol=1e-4), (out, ref)

    # Second check: non-aligned batch exercising the padded + multi-step grid path.
    x2 = jax.random.normal(xkey2, (777, 2), dtype=jnp.float32)
    out2 = jax.block_until_ready(circle_model_1_forward(x2, w_eff, b_eff))
    ref2 = _reference(x2, params)
    assert out2.shape == (777, 1)
    assert jnp.allclose(out2, ref2, atol=1e-4, rtol=1e-4)

    print("KERNEL_OK")
</pallas_src>

<mosaic_0001>
module attributes {stable_mosaic.version = 11 : i64} {
  func.func @_affine_kernel(%arg0: i32, %arg1: memref<8x128xf32, #tpu.memory_space<vmem>>, %arg2: memref<2xf32, #tpu.memory_space<smem>>, %arg3: memref<1xf32, #tpu.memory_space<smem>>, %arg4: memref<4x128xf32, #tpu.memory_space<vmem>>) attributes {dimension_semantics = [#tpu.dimension_semantics<parallel>], iteration_bounds = array<i64: 1>, scalar_prefetch = 0 : i64, scratch_operands = 0 : i64, tpu.core_type = #tpu.core_type<tc>, window_params = [{transform_indices = @transform_0, window_bounds = array<i64: 8, 128>}, {transform_indices = @transform_1, window_bounds = array<i64: 2>}, {transform_indices = @transform_2, window_bounds = array<i64: 1>}, {transform_indices = @transform_3, window_bounds = array<i64: 4, 128>}]} {
    %c0 = arith.constant 0 : index
    %c0_0 = arith.constant 0 : index
    %0 = vector.load %arg1[%c0, %c0_0] : memref<8x128xf32, #tpu.memory_space<vmem>>, vector<8x128xf32>
    %c0_1 = arith.constant 0 : index
    %1 = memref.load %arg2[%c0_1] : memref<2xf32, #tpu.memory_space<smem>>
    %c1 = arith.constant 1 : index
    %2 = memref.load %arg2[%c1] : memref<2xf32, #tpu.memory_space<smem>>
    %c0_2 = arith.constant 0 : index
    %3 = memref.load %arg3[%c0_2] : memref<1xf32, #tpu.memory_space<smem>>
    %4 = vector.extract_strided_slice %0 {offsets = [0, 0], sizes = [4, 128], strides = [1, 1]} : vector<8x128xf32> to vector<4x128xf32>
    %5 = vector.broadcast %1 : f32 to vector<4x128xf32>
    %6 = arith.mulf %4, %5 : vector<4x128xf32>
    %7 = vector.extract_strided_slice %0 {offsets = [4, 0], sizes = [4, 128], strides = [1, 1]} : vector<8x128xf32> to vector<4x128xf32>
    %8 = vector.broadcast %2 : f32 to vector<4x128xf32>
    %9 = arith.mulf %7, %8 : vector<4x128xf32>
    %10 = arith.addf %6, %9 : vector<4x128xf32>
    %11 = vector.broadcast %3 : f32 to vector<4x128xf32>
    %12 = arith.addf %10, %11 : vector<4x128xf32>
    %c0_3 = arith.constant 0 : index
    %c0_4 = arith.constant 0 : index
    %13 = vector.load %arg4[%c0_3, %c0_4] : memref<4x128xf32, #tpu.memory_space<vmem>>, vector<4x128xf32>
    tpu.vector_store %arg4[%c0_3, %c0_4], %12 {strides = array<i32>} : memref<4x128xf32, #tpu.memory_space<vmem>>, vector<4x128xf32>,
    return
  }
  func.func @transform_0(%arg0: i32) -> (i32, i32) {
    %c0_i32 = arith.constant 0 : i32
    %c0_i32_0 = arith.constant 0 : i32
    return %c0_i32, %arg0 : i32, i32
  }
  func.func @transform_1(%arg0: i32) -> i32 {
    %c0_i32 = arith.constant 0 : i32
    %c0_i32_0 = arith.constant 0 : i32
    return %c0_i32 : i32
  }
  func.func @transform_2(%arg0: i32) -> i32 {
    %c0_i32 = arith.constant 0 : i32
    %c0_i32_0 = arith.constant 0 : i32
    return %c0_i32 : i32
  }
  func.func @transform_3(%arg0: i32) -> (i32, i32) {
    %c0_i32 = arith.constant 0 : i32
    %c0_i32_0 = arith.constant 0 : i32
    return %c0_i32, %arg0 : i32, i32
  }
}

</mosaic_0001>

<bundles_post_ra>
// kernel: circle_model_1_forward.1
= control target key start
LH: loop header
LB: loop body
LE: loop exit
PB: predicated region body
PF: predicated region fallthrough
CT: control target
= control target key end

     0   :  { %9 = vsyncpa [#allocation4], 0  ;;  %s97_s0 = inlined_call_operand.vmem [shape: f32[8,128], index: 0, kind: input, shape index: {}]   ;;  %s98_s1 = inlined_call_operand.vmem [shape: f32[2], index: 1, kind: input, shape index: {}]   ;;  %s99_s2 = inlined_call_operand.<no memory space> [shape: f32[1], index: 2, kind: input, shape index: {}]   ;;  %s100_s3 = inlined_call_operand.vmem [shape: f32[4,128], index: 3, kind: output, shape index: {}]  }
   0x1   :  { %s18_s14 = sshll.u32 %s98_s1, 4  ;;  %s19_s14 = int_to_ptr.vmem [resolvable:$true] %s18_s14 }
   0x2   :  { %s50_s15 = scalar_lea.vmem %s19_s14, 16  ;;  %p55_p1 = scmp.lt.s32.totalorder %s19_s14, %s19_s14 }
   0x3   :  { %p51_p0 = scmp.ne.s32.totalorder %s19_s14, %s50_s15  ;;  %p56_p2 = scmp.lt.s32.totalorder %s50_s15, %s50_s15 }
   0x5   :  { %p57_p3 = por %p56_p2, %p55_p1 }
   0x7   :  { %p58_p4 = pnand %p57_p3, %p51_p0 }
   0x9   :  { %61 = shalt.err (!%p58_p4)
}
   0xa   :  { %s64_s16 = smov [#allocation3]  }
   0xb   :  { %21 = dma.vmem_to_smem %s19_s14, 16, %s64_s16, [#allocation4]  }
   0xc   :  { %62 = dma.done.wait [#allocation4], 16  }
   0xd   :  { %63 = vsyncadd [#allocation4], 4294967280 }
   0xe   :  { %27 = sfence }
   0xf   :  { %s29_s17 = sld [smem:[#allocation3]]  ;;  %v28_v0 = vld [vmem:[%s97_s0] sm:$0xff]  ;;  %v40_v6 = vstv %s99_s2 }
  0x10   :  { %s48_s18 = sld [smem:[#allocation3 + $0x1]] }
  0x15   :  { %v32_v1 = vstv %s29_s17 }
  0x16   :  { %v34_v2 = vstv %s48_s18  ;;  %v33_v3 = vmul.f32 %v32_v1, %v28_v0 }
  0x17   :  { %v35_v4 = vmul.f32 %v34_v2, %v28_v0 }
  0x19   :  { %v37_v5 = vrot.slane %v35_v4, 4 }
  0x1b   :  { %v39_v7 = vadd.f32 %v37_v5, %v33_v3 }
  0x1d   :  { %v41_v8 = vadd.f32 %v40_v6, %v39_v7 }
  0x1f   :  { %42 = vst [vmem:[%s100_s3] sm:$0xf] %v41_v8 }
  0x20   :  { %47 = vsyncpa [#allocation4], 1 }

</bundles_post_ra>
